<compile_context>
chip_gen: v7x
topology: tpu7x:2x2x1
jax: 0.10.0
libtpu: 0.0.40
codegen_flags: <defaults>
</compile_context>

<pallas_src>
import functools

import jax
import jax.numpy as jnp
from jax.experimental import pallas as pl
from jax.experimental.pallas import tpu as pltpu


def _round_up(x, m):
    return ((x + m - 1) // m) * m


def _grad_libra_kernel(logits_ref, labels_ref, loss_ref, *, alpha_pos, n_rows):
    """One row-tile: per-row Libra loss written to loss_ref (tm, 1)."""
    i = pl.program_id(0)
    tm = loss_ref.shape[0]

    x = logits_ref[...].astype(jnp.float32)            # (TM, C)
    lbl = labels_ref[...]                               # (TM, 1) int32

    # --- log-softmax over the class (lane) axis ---
    m = jnp.max(x, axis=-1, keepdims=True)              # (TM, 1)
    s = jnp.sum(jnp.exp(x - m), axis=-1, keepdims=True)  # (TM, 1)

    # gather the label-class logit via a one-hot mask (no dynamic gather on TPU)
    col = jax.lax.broadcasted_iota(jnp.int32, x.shape, 1)
    onehot = col == lbl
    x_lbl = jnp.sum(jnp.where(onehot, x, 0.0), axis=-1, keepdims=True)  # (TM, 1)

    # log(pred) directly; clamp at 0 (pred <= 1 always for valid rows, and this
    # keeps garbage rows of the final partial tile from overflowing exp()).
    log_pred = jnp.minimum(x_lbl - m - jnp.log(s), 0.0)  # (TM, 1), <= 0
    pred = jnp.exp(log_pred)

    grads = 1.0 - pred
    weights = grads - alpha_pos * jnp.sin(grads)
    loss = -weights * log_pred                           # (TM, 1)

    # mask rows past the true batch size (tail tile of a cdiv grid)
    row = i * tm + jax.lax.broadcasted_iota(jnp.int32, (tm, 1), 0)
    loss_ref[...] = jnp.where(row < n_rows, loss, 0.0)


def grad_libra_loss(logits, labels, *, alpha_pos=0.0, alpha_neg=0.0,
                    size_average=True, tm=None,
                    vmem_limit_bytes=32 * 1024 * 1024):
    """Pallas implementation of Grad_Libra_Loss.forward.

    logits: (N, C) float, labels: (N,) int.  Returns a scalar.
    alpha_neg is unused by the reference forward pass (kept for signature parity).
    """
    del alpha_neg
    n, c = logits.shape
    labels2d = labels.astype(jnp.int32).reshape(n, 1)
    itemsize = jnp.dtype(logits.dtype).itemsize

    # ---- pick the row tile: as large as comfortably double-buffers in VMEM ----
    if tm is None:
        bytes_per_row = c * itemsize + 4 + 4        # logits + label + loss out
        budget = 16 * 1024 * 1024                   # 2x buffered tiles stay well
        tm = budget // (2 * bytes_per_row)          # under the 32 MiB limit
    tm = min(int(tm), 1024, _round_up(n, 8))
    tm = max(8, (tm // 8) * 8)

    grid = pl.cdiv(n, tm)

    kernel = functools.partial(_grad_libra_kernel,
                               alpha_pos=float(alpha_pos), n_rows=n)

    cost = pl.CostEstimate(
        flops=6 * n * c,
        transcendentals=n * (c + 3),                # exp(C) + log + exp + sin per row
        bytes_accessed=n * c * itemsize + n * 8,
    )

    per_row = pl.pallas_call(
        kernel,
        out_shape=jax.ShapeDtypeStruct((grid * tm, 1), jnp.float32),
        grid_spec=pltpu.PrefetchScalarGridSpec(
            num_scalar_prefetch=0,
            grid=(grid,),
            in_specs=[
                pl.BlockSpec((tm, c), lambda i: (i, 0)),
                pl.BlockSpec((tm, 1), lambda i: (i, 0)),
            ],
            out_specs=pl.BlockSpec((tm, 1), lambda i: (i, 0)),
        ),
        compiler_params=pltpu.CompilerParams(
            dimension_semantics=("parallel",),
            vmem_limit_bytes=vmem_limit_bytes),
        cost_estimate=cost,
    )(logits, labels2d)

    total = jnp.sum(per_row)                        # padded rows contribute 0
    if size_average:
        total = total / jnp.float32(n)              # loss tensor is (N, 1)
    return total


def _reference(logits, labels, alpha_pos=0.0, size_average=True):
    preds = jax.nn.softmax(logits.astype(jnp.float32), axis=1)
    preds = jnp.take_along_axis(preds, labels.reshape(-1, 1), axis=1)
    grads = 1.0 - preds
    weights = grads - alpha_pos * jnp.sin(grads)
    loss = -weights * jnp.log(preds)
    return jnp.mean(loss) if size_average else jnp.sum(loss)


if __name__ == "__main__":
    key = jax.random.PRNGKey(0)
    k1, k2 = jax.random.split(key)

    N, C = 32, 16                       # small classification-style shapes
    logits = jax.random.normal(k1, (N, C), dtype=jnp.float32)
    labels = jax.random.randint(k2, (N,), 0, C, dtype=jnp.int32)

    alpha_pos = 0.5

    out = grad_libra_loss(logits, labels, alpha_pos=alpha_pos,
                          size_average=True)
    out = jax.block_until_ready(out)

    ref = _reference(logits, labels, alpha_pos=alpha_pos, size_average=True)
    assert jnp.allclose(out, ref, rtol=1e-5, atol=1e-6), (out, ref)

    # also exercise the sum-reduction path and a non-divisible batch size
    N2 = 29
    logits2 = jax.random.normal(k1, (N2, C), dtype=jnp.float32)
    labels2 = jax.random.randint(k2, (N2,), 0, C, dtype=jnp.int32)
    out2 = jax.block_until_ready(
        grad_libra_loss(logits2, labels2, alpha_pos=alpha_pos,
                        size_average=False))
    ref2 = _reference(logits2, labels2, alpha_pos=alpha_pos, size_average=False)
    assert jnp.allclose(out2, ref2, rtol=1e-5, atol=1e-5), (out2, ref2)

    print("KERNEL_OK")
</pallas_src>

<mosaic_0001>
module attributes {stable_mosaic.version = 11 : i64} {
  func.func @_grad_libra_kernel(%arg0: i32, %arg1: memref<32x16xf32, #tpu.memory_space<vmem>>, %arg2: memref<32x1xi32, #tpu.memory_space<vmem>>, %arg3: memref<32x1xf32, #tpu.memory_space<vmem>>) attributes {dimension_semantics = [#tpu.dimension_semantics<parallel>], iteration_bounds = array<i64: 1>, scalar_prefetch = 0 : i64, scratch_operands = 0 : i64, tpu.core_type = #tpu.core_type<tc>, window_params = [{transform_indices = @transform_0, window_bounds = array<i64: 32, 16>}, {transform_indices = @transform_1, window_bounds = array<i64: 32, 1>}, {transform_indices = @transform_2, window_bounds = array<i64: 32, 1>}]} {
    %c0 = arith.constant 0 : index
    %c0_0 = arith.constant 0 : index
    %0 = vector.load %arg1[%c0, %c0_0] : memref<32x16xf32, #tpu.memory_space<vmem>>, vector<32x16xf32>
    %c0_1 = arith.constant 0 : index
    %c0_2 = arith.constant 0 : index
    %1 = vector.load %arg2[%c0_1, %c0_2] : memref<32x1xi32, #tpu.memory_space<vmem>>, vector<32x1xi32>
    %cst = arith.constant dense<0xFF800000> : vector<32xf32>
    %2 = vector.multi_reduction <maximumf>, %0, %cst [1] : vector<32x16xf32> to vector<32xf32>
    %3 = vector.shape_cast %2 : vector<32xf32> to vector<32x1xf32>
    %4 = vector.broadcast %3 : vector<32x1xf32> to vector<32x16xf32>
    %5 = arith.subf %0, %4 : vector<32x16xf32>
    %6 = math.exp %5 : vector<32x16xf32>
    %cst_3 = arith.constant dense<0.000000e+00> : vector<32xf32>
    %7 = vector.multi_reduction <add>, %6, %cst_3 [1] : vector<32x16xf32> to vector<32xf32>
    %8 = vector.shape_cast %7 : vector<32xf32> to vector<32x1xf32>
    %9 = tpu.iota {dimensions = array<i32: 1>} : vector<32x16xi32>
    %10 = vector.broadcast %1 : vector<32x1xi32> to vector<32x16xi32>
    %11 = arith.cmpi eq, %9, %10 : vector<32x16xi32>
    %cst_4 = arith.constant 0.000000e+00 : f32
    %12 = vector.broadcast %cst_4 : f32 to vector<32x16xf32>
    %13 = arith.select %11, %0, %12 : vector<32x16xi1>, vector<32x16xf32>
    %cst_5 = arith.constant dense<0.000000e+00> : vector<32xf32>
    %14 = vector.multi_reduction <add>, %13, %cst_5 [1] : vector<32x16xf32> to vector<32xf32>
    %15 = vector.shape_cast %14 : vector<32xf32> to vector<32x1xf32>
    %16 = arith.subf %15, %3 : vector<32x1xf32>
    %17 = math.log %8 : vector<32x1xf32>
    %18 = arith.subf %16, %17 : vector<32x1xf32>
    %cst_6 = arith.constant 0.000000e+00 : f32
    %19 = vector.broadcast %cst_6 : f32 to vector<32x1xf32>
    %20 = arith.minimumf %18, %19 : vector<32x1xf32>
    %21 = math.exp %20 : vector<32x1xf32>
    %cst_7 = arith.constant 1.000000e+00 : f32
    %22 = vector.broadcast %cst_7 : f32 to vector<32x1xf32>
    %23 = arith.subf %22, %21 : vector<32x1xf32>
    %24 = math.sin %23 : vector<32x1xf32>
    %cst_8 = arith.constant 5.000000e-01 : f32
    %25 = vector.broadcast %cst_8 : f32 to vector<32x1xf32>
    %26 = arith.mulf %25, %24 : vector<32x1xf32>
    %27 = arith.subf %23, %26 : vector<32x1xf32>
    %cst_9 = arith.constant 0.000000e+00 : f32
    %28 = vector.broadcast %cst_9 : f32 to vector<32x1xf32>
    %29 = arith.subf %28, %27 : vector<32x1xf32>
    %30 = arith.mulf %29, %20 : vector<32x1xf32>
    %c32_i32 = arith.constant 32 : i32
    %31 = arith.muli %arg0, %c32_i32 : i32
    %32 = tpu.iota {dimensions = array<i32: 0>} : vector<32x1xi32>
    %33 = vector.broadcast %31 : i32 to vector<32x1xi32>
    %34 = arith.addi %33, %32 : vector<32x1xi32>
    %c32_i32_10 = arith.constant 32 : i32
    %35 = vector.broadcast %c32_i32_10 : i32 to vector<32x1xi32>
    %36 = arith.cmpi slt, %34, %35 : vector<32x1xi32>
    %cst_11 = arith.constant 0.000000e+00 : f32
    %37 = vector.broadcast %cst_11 : f32 to vector<32x1xf32>
    %38 = arith.select %36, %30, %37 : vector<32x1xi1>, vector<32x1xf32>
    %c0_12 = arith.constant 0 : index
    %c0_13 = arith.constant 0 : index
    %39 = vector.load %arg3[%c0_12, %c0_13] : memref<32x1xf32, #tpu.memory_space<vmem>>, vector<32x1xf32>
    tpu.vector_store %arg3[%c0_12, %c0_13], %38 {strides = array<i32>} : memref<32x1xf32, #tpu.memory_space<vmem>>, vector<32x1xf32>,
    return
  }
  func.func @transform_0(%arg0: i32) -> (i32, i32) {
    %c0_i32 = arith.constant 0 : i32
    %c0_i32_0 = arith.constant 0 : i32
    return %arg0, %c0_i32 : i32, i32
  }
  func.func @transform_1(%arg0: i32) -> (i32, i32) {
    %c0_i32 = arith.constant 0 : i32
    %c0_i32_0 = arith.constant 0 : i32
    return %arg0, %c0_i32 : i32, i32
  }
  func.func @transform_2(%arg0: i32) -> (i32, i32) {
    %c0_i32 = arith.constant 0 : i32
    %c0_i32_0 = arith.constant 0 : i32
    return %arg0, %c0_i32 : i32, i32
  }
}

</mosaic_0001>

<bundles_post_ra>
// kernel: tpu_custom_call.1
= control target key start
LH: loop header
LB: loop body
LE: loop exit
PB: predicated region body
PF: predicated region fallthrough
CT: control target
= control target key end

     0   :  { %vm19_vm0 = vcmask 130048   ;;  %v663_v3 = vmov 0   ;;  %v56_v25 = vlaneseq  ;;  %s1095_s0 = inlined_call_operand.vmem [shape: f32[32,16], index: 0, kind: input, shape index: {}]   ;;  %s1096_s1 = inlined_call_operand.vmem [shape: s32[32,1], index: 1, kind: input, shape index: {}]   ;;  %s1097_s2 = inlined_call_operand.vmem [shape: f32[32,1], index: 2, kind: output, shape index: {}]  }
   0x1   :  { %v11_v0 = vld [vmem:[%s1095_s0] sm:$0xff]  ;;  %v13_v1 = vld [vmem:[%s1095_s0 + $0x10] sm:$0xff]  ;;  %v694_v2 = vld [vmem:[%s1095_s0 + $0x8] sm:$0xff]  ;;  %622 = vset.pattern.permute.xlu1 %v663_v3  ;;  %621 = vset.pattern.permute.xlu0 %v663_v3 }
   0x2   :  { %v20_v4 = vsel %vm19_vm0, %v11_v0, -inf  ;;  %v26_v5 = vsel %vm19_vm0, %v13_v1, -inf  ;;  %v701_v6 = vld [vmem:[%s1095_s0 + $0x18] sm:$0xff]  ;;  %v23_v7 = vsel %vm19_vm0, %v694_v2, -inf  ;;  %v16_v9 = vld [vmem:[%s1096_s1 + $0x8] sm:$0xff]  ;;  %v17_v10 = vld [vmem:[%s1096_s1 + $0x10] sm:$0xff] }
   0x3   :  { %21 = vmax.xlane.f32.xlu0 %v20_v4  ;;  %27 = vmax.xlane.f32.xlu1 %v26_v5  ;;  %v29_v8 = vsel %vm19_vm0, %v701_v6, -inf  ;;  %v15_v11 = vld [vmem:[%s1096_s1] sm:$0xff]  ;;  %v18_v12 = vld [vmem:[%s1096_s1 + $0x18] sm:$0xff]  ;;  %v57_v27 = vand.u32 127, %v56_v25 }
   0x7   :  { %24 = vmax.xlane.f32.xlu0 %v23_v7  ;;  %30 = vmax.xlane.f32.xlu1 %v29_v8 }
  0x18   :  { %62 = vperm.xlu1 %622, %v16_v9  }
  0x1c   :  { %65 = vperm.xlu1 %622, %v17_v10  }
  0x1d   :  { %59 = vperm.xlu0 %621, %v15_v11  }
  0x20   :  { %68 = vperm.xlu1 %622, %v18_v12  }
  0x90   :  { %v719_v13 = vpop.xlane.xlu0 %21  ;;  %v721_v14 = vpop.xlane.xlu1 %27 }
  0x91   :  { %v32_v15 = vsub.f32 %v11_v0, %v719_v13  ;;  %v34_v16 = vsub.f32 %v13_v1, %v721_v14 }
  0x93   :  { %v36_v17 = vmul.f32 1.442695, %v32_v15  ;;  %v40_v18 = vmul.f32 1.442695, %v34_v16 }
  0x94   :  { %v725_v19 = vpop.xlane.xlu0 %24  ;;  %v727_v20 = vpop.xlane.xlu1 %30 }
  0x95   :  { %623 = vpow2.f32 %v36_v17  ;;  %v33_v21 = vsub.f32 %v694_v2, %v725_v19  ;;  %v35_v22 = vsub.f32 %v701_v6, %v727_v20 }
  0x96   :  { %625 = vpow2.f32 %v40_v18 }
  0x97   :  { %v38_v23 = vmul.f32 1.442695, %v33_v21  ;;  %v42_v24 = vmul.f32 1.442695, %v35_v22 }
  0x98   :  { %v63_v26 = vpop.permute.xlu1 %62 }
  0x99   :  { %627 = vpow2.f32 %v38_v23  ;;  %vm71_vm3 = vcmp.eq.s32.totalorder %v57_v27, %v63_v26 }
  0x9a   :  { %629 = vpow2.f32 %v42_v24  ;;  %v75_v43 = vsel %vm71_vm3, %v694_v2, 0.0 }
  0x9b   :  { %v81_v44 = vsel %vm19_vm0, %v75_v43, 0.0 }
  0x9c   :  { %v66_v28 = vpop.permute.xlu1 %65  ;;  %v60_v32 = vpop.permute.xlu0 %59 }
  0x9d   :  { %vm72_vm1 = vcmp.eq.s32.totalorder %v57_v27, %v66_v28  ;;  %vm70_vm2 = vcmp.eq.s32.totalorder %v57_v27, %v60_v32 }
  0x9e   :  { %v76_v35 = vsel %vm72_vm1, %v13_v1, 0.0  ;;  %v74_v40 = vsel %vm70_vm2, %v11_v0, 0.0 }
  0x9f   :  { %v624_v29 = vpop.eup %623  ;;  %v84_v39 = vsel %vm19_vm0, %v76_v35, 0.0  ;;  %v78_v41 = vsel %vm19_vm0, %v74_v40, 0.0 }
  0xa0   :  { %v626_v30 = vpop.eup %625  ;;  %v44_v31 = vsel %vm19_vm0, %v624_v29, 0.0  ;;  %v69_v42 = vpop.permute.xlu1 %68 }
  0xa1   :  { %45 = vadd.xlane.f32.xlu1 %v44_v31  ;;  %v50_v33 = vsel %vm19_vm0, %v626_v30, 0.0  ;;  %vm73_vm4 = vcmp.eq.s32.totalorder %v57_v27, %v69_v42 }
  0xa2   :  { %v77_v45 = vsel %vm73_vm4, %v701_v6, 0.0 }
  0xa3   :  { %v628_v34 = vpop.eup %627  ;;  %v87_v46 = vsel %vm19_vm0, %v77_v45, 0.0 }
  0xa4   :  { %v630_v36 = vpop.eup %629  ;;  %v47_v37 = vsel %vm19_vm0, %v628_v34, 0.0 }
  0xa5   :  { %51 = vadd.xlane.f32.xlu1 %v50_v33  ;;  %48 = vadd.xlane.f32.xlu0 %v47_v37  ;;  %v53_v38 = vsel %vm19_vm0, %v630_v36, 0.0 }
  0xa9   :  { %54 = vadd.xlane.f32.xlu1 %v53_v38  ;;  %85 = vadd.xlane.f32.xlu0 %v84_v39 }
  0xad   :  { %79 = vadd.xlane.f32.xlu1 %v78_v41 }
  0xb1   :  { %82 = vadd.xlane.f32.xlu1 %v81_v44 }
  0xb5   :  { %88 = vadd.xlane.f32.xlu1 %v87_v46 }
 0x12e   :  { %v46_v47 = vpop.xlane.xlu1 %45 }
 0x12f   :  { %631 = vlog2.f32 %v46_v47 }
 0x132   :  { %v52_v48 = vpop.xlane.xlu1 %51  ;;  %v49_v49 = vpop.xlane.xlu0 %48 }
 0x133   :  { %633 = vlog2.f32 %v52_v48  ;;  %v664_v48 = vmov 683565275  }
 0x134   :  { %635 = vlog2.f32 %v49_v49 }
 0x136   :  { %v55_v50 = vpop.xlane.xlu1 %54  ;;  %v86_v54 = vpop.xlane.xlu0 %85 }
 0x137   :  { %637 = vlog2.f32 %v55_v50  ;;  %v92_v60 = vsub.f32 %v86_v54, %v721_v14  ;;  %v666_v54 = vmov 2131351028  }
 0x139   :  { %v632_v51 = vpop.eup %631 }
 0x13a   :  { %v95_v52 = vmul.f32 0.6931472, %v632_v51  ;;  %v80_v53 = vpop.xlane.xlu1 %79  ;;  %v665_v51 = vmov 2475754826  }
 0x13b   :  { %v90_v55 = vsub.f32 %v80_v53, %v719_v13 }
 0x13d   :  { %v634_v56 = vpop.eup %633  ;;  %v744_v57 = vsub.f32 %v90_v55, %v95_v52 }
 0x13e   :  { %v636_v58 = vpop.eup %635  ;;  %v99_v59 = vmul.f32 0.6931472, %v634_v56  ;;  %v83_v61 = vpop.xlane.xlu1 %82  ;;  %v667_v56 = vmov 2102212464  }
 0x13f   :  { %v97_v62 = vmul.f32 0.6931472, %v636_v58  ;;  %v106_v63 = vmin.f32 %v744_v57, 0.0  ;;  %v91_v0 = vsub.f32 %v83_v61, %v725_v19 }
 0x140   :  { %v749_v1 = vsub.f32 %v92_v60, %v99_v59 }
 0x141   :  { %v110_v2 = vmul.f32 1.442695, %v106_v63  ;;  %v753_v3 = vsub.f32 %v91_v0, %v97_v62  ;;  %v638_v8 = vpop.eup %637 }
 0x142   :  { %v108_v4 = vmin.f32 %v749_v1, 0.0  ;;  %v89_v9 = vpop.xlane.xlu1 %88  ;;  %v101_v10 = vmul.f32 0.6931472, %v638_v8 }
 0x143   :  { %639 = vpow2.f32 %v110_v2  ;;  %v107_v5 = vmin.f32 %v753_v3, 0.0  ;;  %v93_v11 = vsub.f32 %v89_v9, %v727_v20 }
 0x144   :  { %v114_v6 = vmul.f32 1.442695, %v108_v4 }
 0x145   :  { %v112_v7 = vmul.f32 1.442695, %v107_v5  ;;  %v764_v14 = vsub.f32 %v93_v11, %v101_v10 }
 0x146   :  { %641 = vpow2.f32 %v114_v6 }
 0x147   :  { %643 = vpow2.f32 %v112_v7  ;;  %v109_v25 = vmin.f32 %v764_v14, 0.0  ;;  %v668_v7 = vmov 920167782  }
 0x149   :  { %v116_v34 = vmul.f32 1.442695, %v109_v25 }
 0x14b   :  { %645 = vpow2.f32 %v116_v34 }
 0x14d   :  { %v640_v12 = vpop.eup %639 }
 0x14e   :  { %v762_v13 = vsub.f32 1.0, %v640_v12 }
 0x150   :  { %v642_v15 = vpop.eup %641  ;;  %v122_v16 = vand.u32 2147483647, %v762_v13  ;;  %v125_v17 = vand.u32 2139095040, %v762_v13 }
 0x151   :  { %v644_v18 = vpop.eup %643  ;;  %v768_v19 = vsub.f32 1.0, %v642_v15 }
 0x152   :  { %v126_v21 = vshrl.u32 %v125_v17, 23  ;;  %v770_v22 = vsub.f32 1.0, %v644_v18  ;;  %v129_v24 = vand.u32 8388607, %v122_v16  ;;  %v669_v17 = vmov 1326507024  }
 0x153   :  { %v330_v23 = vand.u32 2147483647, %v768_v19  ;;  %v333_v20 = vand.u32 2139095040, %v768_v19  ;;  %vm332_vm2 = vcmp.lt.s32.totalorder %v768_v19, 0 }
 0x154   :  { %v582_v26 = vadd.s32 4294967169, %v126_v21  ;;  %v229_v29 = vand.u32 2139095040, %v770_v22  ;;  %v130_v32 = vor.u32 8388608, %v129_v24  ;;  %v226_v41 = vand.u32 2147483647, %v770_v22 }
 0x155   :  { %v334_v27 = vshrl.u32 %v333_v20, 23  ;;  %v337_v28 = vand.u32 8388607, %v330_v23 }
 0x156   :  { %v132_v30 = vadd.s32 1, %v582_v26  ;;  %v230_v33 = vshrl.u32 %v229_v29, 23  ;;  %v784_v40 = vshll.u32 %v130_v32, 8  ;;  %v816_v29 = vpop.eup %645 }
 0x157   :  { %v590_v31 = vadd.s32 4294967169, %v334_v27  ;;  %v338_v35 = vor.u32 8388608, %v337_v28 }
 0x158   :  { %vm133_vm5 = vcmp.gt.s32.totalorder %v132_v30, 0  ;;  %v586_v38 = vadd.s32 4294967169, %v230_v33 }
 0x159   :  { %v340_v36 = vadd.s32 1, %v590_v31  ;;  %v134_v37 = vsel %vm133_vm5, %v132_v30, 0  ;;  %v787_v43 = vshll.u32 %v338_v35, 8 }
 0x15a   :  { %v782_v39 = vand.u32 31, %v134_v37  ;;  %v789_v44 = vshrl.u32 %v134_v37, 5  ;;  %v794_v50 = vadd.s32 1, %v586_v38 }
 0x15b   :  { %vm341_vm6 = vcmp.gt.s32.totalorder %v340_v36, 0 }
 0x15c   :  { %v342_v42 = vsel %vm341_vm6, %v340_v36, 0  ;;  %v137_v45 = vsub.s32 32, %v782_v39  ;;  %v139_v49 = vshll.u32 %v664_v48, %v782_v39  ;;  %v142_v53 = vshll.u32 %v665_v51, %v782_v39 }
 0x15d   :  { %v343_v46 = vshrl.u32 %v342_v42, 5  ;;  %v344_v47 = vand.u32 31, %v342_v42  ;;  %v145_v55 = vshll.u32 %v666_v54, %v782_v39  ;;  %v148_v58 = vshll.u32 %v667_v56, %v782_v39 }
 0x15e   :  { %v140_v52 = vshrl.u32 %v665_v51, %v137_v45  ;;  %v143_v61 = vshrl.u32 %v666_v54, %v137_v45  ;;  %v146_v62 = vshrl.u32 %v667_v56, %v137_v45  ;;  %v149_v37 = vshrl.u32 %v668_v7, %v137_v45 }
 0x15f   :  { %v345_v59 = vsub.s32 32, %v344_v47  ;;  %v347_v60 = vshll.u32 %v664_v48, %v344_v47  ;;  %v350_v0 = vshll.u32 %v665_v51, %v344_v47  ;;  %v353_v2 = vshll.u32 %v666_v54, %v344_v47 }
 0x160   :  { %v356_v6 = vshll.u32 %v667_v56, %v344_v47  ;;  %v359_v8 = vshll.u32 %v668_v7, %v344_v47  ;;  %vm362_vm7 = vcmp.lt.s32.totalorder %v343_v46, 1  ;;  %vm363_vm8 = vcmp.lt.s32.totalorder %v343_v46, 2 }
 0x161   :  { %v348_v9 = vshrl.u32 %v665_v51, %v345_v59  ;;  %v351_v10 = vshrl.u32 %v666_v54, %v345_v59  ;;  %v354_v11 = vshrl.u32 %v667_v56, %v345_v59  ;;  %v346_v12 = vshrl.u32 %v664_v48, %v345_v59 }
 0x162   :  { %v357_v15 = vshrl.u32 %v668_v7, %v345_v59  ;;  %v360_v18 = vshrl.u32 %v669_v17, %v345_v59  ;;  %vm364_vm9 = vcmp.lt.s32.totalorder %v343_v46, 3  ;;  %vm365_vm10 = vcmp.lt.s32.totalorder %v343_v46, 4 }
 0x163   :  { %v349_v21 = vor.u32 %v348_v9, %v347_v60  ;;  %v352_v20 = vor.u32 %v351_v10, %v350_v0  ;;  %v355_v24 = vor.u32 %v354_v11, %v353_v2  ;;  %v141_v28 = vor.u32 %v140_v52, %v139_v49 }
 0x164   :  { %v358_v26 = vor.u32 %v357_v15, %v356_v6  ;;  %v361_v27 = vor.u32 %v360_v18, %v359_v8  ;;  %v144_v47 = vor.u32 %v143_v61, %v142_v53  ;;  %v147_v59 = vor.u32 %v146_v62, %v145_v55 }
 0x165   :  { %v366_v30 = vsel %vm362_vm7, %v346_v12, %v349_v21  ;;  %v367_v31 = vsel %vm365_vm10, %v355_v24, 2102212464  ;;  %v370_v32 = vsel %vm362_vm7, %v349_v21, %v352_v20  ;;  %v374_v33 = vsel %vm362_vm7, %v352_v20, %v355_v24 }
 0x166   :  { %v368_v34 = vsel %vm364_vm9, %v352_v20, %v367_v31  ;;  %v371_v35 = vsel %vm365_vm10, %v358_v26, 920167782  ;;  %v375_v36 = vsel %vm365_vm10, %v361_v27, 1326507024  ;;  %v150_v0 = vor.u32 %v149_v37, %v148_v58 }
 0x167   :  { %v372_v38 = vsel %vm364_vm9, %v355_v24, %v371_v35  ;;  %v376_v42 = vsel %vm364_vm9, %v358_v26, %v375_v36  ;;  %v369_v49 = vsel %vm363_vm8, %v366_v30, %v368_v34  ;;  %v138_v10 = vshrl.u32 %v664_v48, %v137_v45 }
 0x168   :  { %v373_v52 = vsel %vm363_vm8, %v370_v32, %v372_v38  ;;  %v377_v60 = vsel %vm363_vm8, %v374_v33, %v376_v42  ;;  %v151_v53 = vshll.u32 %v668_v7, %v782_v39  ;;  %v152_v55 = vshrl.u32 %v669_v17, %v137_v45 }
 0x169   :  { %v826_v2 = vmul.u32.u64.low %v787_v43, %v377_v60  ;;  %v827_v6 = vmul.u32.u64.high %v787_v43, %v377_v60, %v826_v2  ;;  %v830_v8 = vmul.u32.u64.low %v787_v43, %v373_v52  ;;  %v831_v9 = vmul.u32.u64.high %v787_v43, %v373_v52, %v830_v8 }
 0x16a   :  { %vm154_vm11 = vcmp.lt.s32.totalorder %v789_v44, 1  ;;  %v385_v46 = vmul.u32 %v787_v43, %v369_v49  ;;  %vm155_vm12 = vcmp.lt.s32.totalorder %v789_v44, 2  ;;  %vm157_vm13 = vcmp.lt.s32.totalorder %v789_v44, 4 }
 0x16b   :  { %v162_v58 = vsel %vm154_vm11, %v141_v28, %v144_v47  ;;  %v153_v61 = vor.u32 %v152_v55, %v151_v53  ;;  %v159_v62 = vsel %vm157_vm13, %v147_v59, 2102212464  ;;  %v163_v11 = vsel %vm157_vm13, %v150_v0, 920167782 }
 0x16c   :  { %vm237_vm14 = vcmp.gt.s32.totalorder %v794_v50, 0  ;;  %vm387_vm15 = vc.u32 %v827_v6, %v830_v8  ;;  %v388_v39 = vadd.s32 1, %v831_v9  ;;  %vm156_vm0 = vcmp.lt.s32.totalorder %v789_v44, 3 }
 0x16d   :  { %v166_v45 = vsel %vm154_vm11, %v144_v47, %v147_v59  ;;  %v158_v12 = vsel %vm154_vm11, %v138_v10, %v141_v28  ;;  %v164_v43 = vsel %vm156_vm0, %v147_v59, %v163_v11  ;;  %v167_v15 = vsel %vm157_vm13, %v153_v61, 1326507024 }
 0x16e   :  { %v238_v18 = vsel %vm237_vm14, %v794_v50, 0  ;;  %v389_v21 = vsel %vm387_vm15, %v388_v39, %v831_v9  ;;  %v160_v20 = vsel %vm156_vm0, %v144_v47, %v159_v62  ;;  %v165_v24 = vsel %vm155_vm12, %v162_v58, %v164_v43 }
 0x16f   :  { %v168_v26 = vsel %vm156_vm0, %v150_v0, %v167_v15  ;;  %v390_v27 = vadd.s32 %v389_v21, %v385_v46  ;;  %v854_v31 = vmul.u32.u64.low %v784_v40, %v165_v24  ;;  %v855_v32 = vmul.u32.u64.high %v784_v40, %v165_v24, %v854_v31 }
 0x170   :  { %v169_v30 = vsel %vm155_vm12, %v166_v45, %v168_v26  ;;  %v240_v50 = vand.u32 31, %v238_v18  ;;  %v161_v35 = vsel %vm155_vm12, %v158_v12, %v160_v20  ;;  %v233_v36 = vand.u32 8388607, %v226_v41 }
 0x171   :  { %v859_v28 = vmul.u32.u64.low %v784_v40, %v169_v30  ;;  %v860_v33 = vmul.u32.u64.high %v784_v40, %v169_v30, %v859_v28  ;;  %v391_v34 = vadd.s32 536870912, %v390_v27  ;;  %v180_v42 = vadd.s32 1, %v855_v32 }
 0x172   :  { %v241_v37 = vsub.s32 32, %v240_v50  ;;  %v177_v47 = vmul.u32 %v784_v40, %v161_v35  ;;  %v234_v0 = vor.u32 8388608, %v233_v36  ;;  %v878_v9 = vsub.f32 1.0, %v816_v29 }
 0x173   :  { %v866_v38 = vshrl.u32 %v391_v34, 30  ;;  %vm179_vm1 = vc.u32 %v860_v33, %v854_v31  ;;  %v243_v40 = vshll.u32 %v664_v48, %v240_v50  ;;  %v246_v53 = vshll.u32 %v665_v51, %v240_v50 }
 0x174   :  { %v181_v49 = vsel %vm179_vm1, %v180_v42, %v855_v32  ;;  %v244_v44 = vshrl.u32 %v665_v51, %v241_v37  ;;  %v247_v52 = vshrl.u32 %v666_v54, %v241_v37  ;;  %v253_v2 = vshrl.u32 %v668_v7, %v241_v37 }
 0x175   :  { %v393_v59 = vshll.u32 %v866_v38, 30  ;;  %v182_v60 = vadd.s32 %v181_v49, %v177_v47  ;;  %v250_v55 = vshrl.u32 %v667_v56, %v241_v37  ;;  %v239_v58 = vshrl.u32 %v238_v18, 5 }
 0x176   :  { %v252_v61 = vshll.u32 %v667_v56, %v240_v50  ;;  %v256_v62 = vshrl.u32 %v669_v17, %v241_v37  ;;  %v245_v39 = vor.u32 %v244_v44, %v243_v40  ;;  %v248_v45 = vor.u32 %v247_v52, %v246_v53 }
 0x177   :  { %v880_v10 = vsub.s32 %v390_v27, %v393_v59  ;;  %v183_v46 = vadd.s32 536870912, %v182_v60  ;;  %v249_v29 = vshll.u32 %v666_v54, %v240_v50  ;;  %v255_v15 = vshll.u32 %v668_v7, %v240_v50 }
 0x178   :  { %v254_v43 = vor.u32 %v253_v2, %v252_v61  ;;  %v894_v20 = vshll.u32 %v234_v0, 8  ;;  %v437_v24 = vand.u32 2139095040, %v878_v9  ;;  %v386_v26 = vadd.s32 %v830_v8, %v827_v6 }
 0x179   :  { %v396_v11 = vsub.s32 0, %v880_v10  ;;  %v889_v12 = vshrl.u32 %v183_v46, 30  ;;  %v251_v18 = vor.u32 %v250_v55, %v249_v29  ;;  %v257_v30 = vor.u32 %v256_v62, %v255_v15 }
 0x17a   :  { %vm258_vm3 = vcmp.lt.s32.totalorder %v239_v58, 1  ;;  %v242_v28 = vshrl.u32 %v664_v48, %v241_v37  ;;  %vm261_vm4 = vcmp.lt.s32.totalorder %v239_v58, 4  ;;  %v416_v34 = vsub.s32 4, %v866_v38 }
 0x17b   :  { %v591_v21 = vmin.u32 %v396_v11, %v880_v10  ;;  %v185_v27 = vshll.u32 %v889_v12, 30  ;;  %v266_v50 = vsel %vm258_vm3, %v245_v39, %v248_v45  ;;  %vm260_vm5 = vcmp.lt.s32.totalorder %v239_v58, 3 }
 0x17c   :  { %v267_v36 = vsel %vm261_vm4, %v254_v43, 920167782  ;;  %vm259_vm6 = vcmp.lt.s32.totalorder %v239_v58, 2  ;;  %v270_v8 = vsel %vm258_vm3, %v248_v45, %v251_v18  ;;  %v263_v59 = vsel %vm261_vm4, %v251_v18, 2102212464 }
 0x17d   :  { %v398_v32 = vclz %v591_v21  ;;  %v903_v35 = vsub.s32 %v182_v60, %v185_v27  ;;  %v268_v6 = vsel %vm260_vm5, %v251_v18, %v267_v36  ;;  %v271_v49 = vsel %vm261_vm4, %v257_v30, 1326507024 }
 0x17e   :  { %v269_v37 = vsel %vm259_vm6, %v266_v50, %v268_v6  ;;  %v272_v44 = vsel %vm260_vm5, %v254_v43, %v271_v49  ;;  %v438_v53 = vshrl.u32 %v437_v24, 23  ;;  %v262_v61 = vsel %vm258_vm3, %v242_v28, %v245_v39 }
 0x17f   :  { %v592_v42 = vadd.s32 4294967294, %v398_v32  ;;  %v188_v47 = vsub.s32 0, %v903_v35  ;;  %v911_v52 = vmul.u32.u64.low %v894_v20, %v269_v37  ;;  %v912_v60 = vmul.u32.u64.high %v894_v20, %v269_v37, %v911_v52 }
 0x180   :  { %v273_v40 = vsel %vm259_vm6, %v270_v8, %v272_v44  ;;  %v264_v62 = vsel %vm260_vm5, %v248_v45, %v263_v59  ;;  %v417_v29 = vsel %vm332_vm2, %v416_v34, %v866_v38  ;;  %vm124_vm8 = vcmp.lt.s32.totalorder %v762_v13, 0 }
 0x181   :  { %vm593_vm7 = vcmp.lt.s32.totalorder %v592_v42, 0  ;;  %v583_v2 = vmin.u32 %v188_v47, %v903_v35  ;;  %v925_v18 = vmul.u32.u64.low %v894_v20, %v273_v40  ;;  %v926_v24 = vmul.u32.u64.high %v894_v20, %v273_v40, %v925_v18 }
 0x182   :  { %v401_v0 = vsel %vm593_vm7, 0, %v592_v42  ;;  %vm930_vm9 = vcmp.le.f32.partialorder %v330_v23, 0.7853982  ;;  %v265_v45 = vsel %vm259_vm6, %v262_v61, %v264_v62  ;;  %v594_v27 = vadd.s32 4294967169, %v438_v53 }
 0x183   :  { %v402_v55 = vsub.s32 32, %v401_v0  ;;  %v406_v46 = vsub.s32 4294967266, %v401_v0  ;;  %v403_v11 = vshll.u32 %v880_v10, %v401_v0  ;;  %v190_v43 = vclz %v583_v2 }
 0x184   :  { %v284_v32 = vadd.s32 1, %v912_v60  ;;  %v419_v28 = vsel %vm930_vm9, 0, %v417_v29  ;;  %v178_v50 = vadd.s32 %v854_v31, %v860_v33  ;;  %v444_v23 = vadd.s32 1, %v594_v27 }
 0x185   :  { %v404_v15 = vshrl.u32 %v386_v26, %v402_v55  ;;  %v407_v21 = vadd.s32 127, %v406_v46  ;;  %v584_v10 = vadd.s32 4294967294, %v190_v43  ;;  %v434_v26 = vand.u32 2147483647, %v878_v9 }
 0x186   :  { %v208_v58 = vsub.s32 4, %v889_v12  ;;  %v281_v42 = vmul.u32 %v894_v20, %v265_v45  ;;  %vm283_vm11 = vc.u32 %v926_v24, %v911_v52  ;;  %vm445_vm12 = vcmp.gt.s32.totalorder %v444_v23, 0 }
 0x187   :  { %v405_v38 = vor.u32 %v404_v15, %v403_v11  ;;  %v408_v30 = vshll.u32 %v407_v21, 23  ;;  %vm585_vm10 = vcmp.lt.s32.totalorder %v584_v10, 0  ;;  %v285_v49 = vsel %vm283_vm11, %v284_v32, %v912_v60 }
 0x188   :  { %v193_v36 = vsel %vm585_vm10, 0, %v584_v10  ;;  %v286_v44 = vadd.s32 %v285_v49, %v281_v42  ;;  %v446_v0 = vsel %vm445_vm12, %v444_v23, 0  ;;  %v423_v40 = vadd.s32 3, %v419_v28 }
 0x189   :  { %v409_v34 = vor.u32 4788187, %v408_v30  ;;  %v412_v6 = vcvt.s32.f32 %v405_v38  ;;  %v194_v8 = vsub.s32 32, %v193_v36  ;;  %v198_v47 = vsub.s32 4294967266, %v193_v36 }
 0x18a   :  { %v195_v37 = vshll.u32 %v903_v35, %v193_v36  ;;  %v209_v20 = vsel %vm124_vm8, %v208_v58, %v889_v12  ;;  %v448_v53 = vand.u32 31, %v446_v0  ;;  %v287_v61 = vadd.s32 536870912, %v286_v44 }
 0x18b   :  { %v410_v59 = vand.u32 2147483647, %v409_v34  ;;  %v196_v31 = vshrl.u32 %v178_v50, %v194_v8  ;;  %v199_v33 = vadd.s32 127, %v198_v47  ;;  %vm952_vm13 = vcmp.le.f32.partialorder %v122_v16, 0.7853982 }
 0x18c   :  { %v441_v60 = vand.u32 8388607, %v434_v26  ;;  %v449_v11 = vsub.s32 32, %v448_v53  ;;  %v211_v43 = vsel %vm952_vm13, 0, %v209_v20  ;;  %v960_v12 = vshrl.u32 %v287_v61, 30 }
 0x18d   :  { %v413_v2 = vmul.f32 %v412_v6, %v410_v59  ;;  %v197_v55 = vor.u32 %v196_v31, %v195_v37  ;;  %v200_v46 = vshll.u32 %v199_v33, 23  ;;  %v964_v21 = vand.u32 3, %v423_v40 }
 0x18e   :  { %v289_v45 = vshll.u32 %v960_v12, 30  ;;  %v215_v27 = vadd.s32 3, %v211_v43  ;;  %v442_v38 = vor.u32 8388608, %v441_v60  ;;  %v455_v30 = vshrl.u32 %v666_v54, %v449_v11 }
 0x18f   :  { %v414_v62 = vxor.u32 2147483648, %v413_v2  ;;  %v201_v29 = vor.u32 4788187, %v200_v46  ;;  %v204_v10 = vcvt.s32.f32 %v197_v55  ;;  %v458_v50 = vshrl.u32 %v667_v56, %v449_v11 }
 0x190   :  { %v971_v28 = vsub.s32 %v286_v44, %v289_v45  ;;  %v974_v23 = vshrl.u32 %v446_v0, 5  ;;  %v452_v39 = vshrl.u32 %v665_v51, %v449_v11  ;;  %v454_v34 = vshll.u32 %v665_v51, %v448_v53 }
 0x191   :  { %v415_v15 = vsel %vm332_vm2, %v414_v62, %v413_v2  ;;  %v202_v18 = vand.u32 2147483647, %v201_v29  ;;  %v461_v36 = vshrl.u32 %v668_v7, %v449_v11  ;;  %v457_v6 = vshll.u32 %v666_v54, %v448_v53 }
 0x192   :  { %v418_v16 = vsel %vm930_vm9, %v768_v19, %v415_v15  ;;  %v292_v42 = vsub.s32 0, %v971_v28  ;;  %v460_v8 = vshll.u32 %v667_v56, %v448_v53  ;;  %vm429_vm14 = vcmp.eq.s32.totalorder %v964_v21, 2 }
 0x193   :  { %647 = vcosq.f32 %v418_v16  ;;  %v205_v32 = vmul.f32 %v204_v10, %v202_v18  ;;  %v451_v47 = vshll.u32 %v664_v48, %v448_v53  ;;  %v456_v59 = vor.u32 %v455_v30, %v454_v34 }
 0x194   :  { %649 = vsinq.f32 %v418_v16  ;;  %v463_v37 = vshll.u32 %v668_v7, %v448_v53  ;;  %v464_v49 = vshrl.u32 %v669_v17, %v449_v11  ;;  %vm426_vm15 = vcmp.eq.s32.totalorder %v964_v21, 0 }
 0x195   :  { %v206_v58 = vxor.u32 2147483648, %v205_v32  ;;  %v587_v31 = vmin.u32 %v292_v42, %v971_v28  ;;  %v459_v33 = vor.u32 %v458_v50, %v457_v6  ;;  %v462_v54 = vor.u32 %v461_v36, %v460_v8 }
 0x196   :  { %vm425_vm0 = vcmp.lt.s32.totalorder %v964_v21, 2  ;;  %v994_v44 = vand.u32 3, %v215_v27  ;;  %v453_v7 = vor.u32 %v452_v39, %v451_v47  ;;  %v465_v0 = vor.u32 %v464_v49, %v463_v37 }
 0x197   :  { %v207_v51 = vsel %vm124_vm8, %v206_v58, %v205_v32  ;;  %vm422_vm1 = vweird.f32 %v768_v19  ;;  %v282_v17 = vadd.s32 %v911_v52, %v926_v24  ;;  %v294_v2 = vclz %v587_v31 }
 0x198   :  { %v210_v56 = vsel %vm952_vm13, %v762_v13, %v207_v51  ;;  %v999_v40 = vshll.u32 %v442_v38, 8  ;;  %v450_v20 = vshrl.u32 %v664_v48, %v449_v11  ;;  %vm466_vm2 = vcmp.lt.s32.totalorder %v974_v23, 1 }
 0x199   :  { %651 = vcosq.f32 %v210_v56  ;;  %vm469_vm3 = vcmp.lt.s32.totalorder %v974_v23, 4  ;;  %v588_v53 = vadd.s32 4294967294, %v294_v2  ;;  %vm468_vm4 = vcmp.lt.s32.totalorder %v974_v23, 3 }
 0x19a   :  { %653 = vsinq.f32 %v210_v56  ;;  %v475_v55 = vsel %vm469_vm3, %v462_v54, 920167782  ;;  %v478_v46 = vsel %vm466_vm2, %v456_v59, %v459_v33  ;;  %vm467_vm5 = vcmp.lt.s32.totalorder %v974_v23, 2 }
 0x19b   :  { %v474_v52 = vsel %vm466_vm2, %v453_v7, %v456_v59  ;;  %v476_v48 = vsel %vm468_vm4, %v459_v33, %v475_v55  ;;  %v479_v24 = vsel %vm469_vm3, %v465_v0, 1326507024  ;;  %vm589_vm6 = vcmp.lt.s32.totalorder %v588_v53, 0 }
 0x19c   :  { %v471_v60 = vsel %vm469_vm3, %v459_v33, 2102212464  ;;  %v480_v11 = vsel %vm468_vm4, %v462_v54, %v479_v24  ;;  %v297_v43 = vsel %vm589_vm6, 0, %v588_v53  ;;  %v470_v15 = vsel %vm466_vm2, %v450_v20, %v453_v7 }
 0x19d   :  { %v648_v61 = vpop.eup %647  ;;  %v481_v16 = vsel %vm467_vm5, %v478_v46, %v480_v11  ;;  %v298_v10 = vsub.s32 32, %v297_v43  ;;  %v302_v45 = vsub.s32 4294967266, %v297_v43  ;;  %v477_v27 = vsel %vm467_vm5, %v474_v52, %v476_v48 }
 0x19e   :  { %v650_v62 = vpop.eup %649  ;;  %v430_v35 = vxor.u32 2147483648, %v648_v61  ;;  %v472_v30 = vsel %vm468_vm4, %v456_v59, %v471_v60  ;;  %v1027_v32 = vmul.u32.u64.low %v999_v40, %v481_v16  ;;  %v1028_v50 = vmul.u32.u64.high %v999_v40, %v481_v16, %v1027_v32 }
 0x19f   :  { %v427_v29 = vxor.u32 2147483648, %v650_v62  ;;  %v299_v34 = vshll.u32 %v971_v28, %v297_v43  ;;  %v300_v36 = vshrl.u32 %v282_v17, %v298_v10  ;;  %v303_v58 = vadd.s32 127, %v302_v45 }
 0x1a0   :  { %v431_v18 = vsel %vm429_vm14, %v430_v35, %v650_v62  ;;  %v1036_v6 = vmul.u32.u64.low %v999_v40, %v477_v27  ;;  %v1037_v8 = vmul.u32.u64.high %v999_v40, %v477_v27, %v1036_v6  ;;  %v473_v21 = vsel %vm467_vm5, %v470_v15, %v472_v30 }
 0x1a1   :  { %v428_v38 = vsel %vm426_vm15, %v648_v61, %v427_v29  ;;  %v301_v37 = vor.u32 %v300_v36, %v299_v34  ;;  %v304_v49 = vshll.u32 %v303_v58, 23  ;;  %vm217_vm7 = vcmp.lt.s32.totalorder %v994_v44, 2 }
 0x1a2   :  { %v432_v39 = vsel %vm425_vm0, %v428_v38, %v431_v18  ;;  %vm221_vm8 = vcmp.eq.s32.totalorder %v994_v44, 2  ;;  %vm491_vm9 = vc.u32 %v1028_v50, %v1036_v6  ;;  %vm218_vm10 = vcmp.eq.s32.totalorder %v994_v44, 0 }
 0x1a3   :  { %v433_v42 = vsel %vm422_vm1, nan, %v432_v39  ;;  %v652_v47 = vpop.eup %651  ;;  %v305_v54 = vor.u32 4788187, %v304_v49  ;;  %v489_v7 = vmul.u32 %v999_v40, %v473_v21  ;;  %v492_v23 = vadd.s32 1, %v1037_v8 }
 0x1a4   :  { %v540_v59 = vmul.f32 0.5, %v433_v42  ;;  %v654_v51 = vpop.eup %653  ;;  %v222_v28 = vxor.u32 2147483648, %v652_v47  ;;  %v308_v20 = vcvt.s32.f32 %v301_v37  ;;  %vm214_vm11 = vweird.f32 %v762_v13 }
 0x1a5   :  { %v219_v33 = vxor.u32 2147483648, %v654_v51  ;;  %v306_v2 = vand.u32 2147483647, %v305_v54  ;;  %v312_v53 = vsub.s32 4, %v960_v12  ;;  %v493_v55 = vsel %vm491_vm9, %v492_v23, %v1037_v8 }
 0x1a6   :  { %v544_v31 = vsub.f32 %v768_v19, %v540_v59  ;;  %v223_v56 = vsel %vm221_vm8, %v222_v28, %v654_v51  ;;  %v494_v52 = vadd.s32 %v493_v55, %v489_v7  ;;  %vm573_vm12 = vcmask 7168  }
 0x1a7   :  { %v220_v17 = vsel %vm218_vm10, %v652_v47, %v219_v33  ;;  %v309_v40 = vmul.f32 %v308_v20, %v306_v2  ;;  %vm228_vm13 = vcmp.lt.s32.totalorder %v770_v22, 0  ;;  %vm227_vm14 = vcmp.le.f32.partialorder %v226_v41, 0.7853982 }
 0x1a8   :  { %v548_v0 = vsub.f32 0.0, %v544_v31  ;;  %v224_v19 = vsel %vm217_vm7, %v220_v17, %v223_v56  ;;  %v495_v44 = vadd.s32 536870912, %v494_v52  ;;  %v490_v34 = vadd.s32 %v1036_v6, %v1028_v50 }
 0x1a9   :  { %v225_v61 = vsel %vm214_vm11, nan, %v224_v19  ;;  %v310_v24 = vxor.u32 2147483648, %v309_v40  ;;  %vm318_vm3 = vweird.f32 %v770_v22  ;;  %vm436_vm4 = vcmp.lt.s32.totalorder %v878_v9, 0 }
 0x1aa   :  { %v552_v46 = vmul.f32 %v548_v0, %v108_v4  ;;  %v538_v48 = vmul.f32 0.5, %v225_v61  ;;  %v313_v4 = vsel %vm228_vm13, %v312_v53, %v960_v12  ;;  %v496_v35 = vshrl.u32 %v495_v44, 30 }
 0x1ab   :  { %v311_v1 = vsel %vm228_vm13, %v310_v24, %v309_v40  ;;  %v315_v15 = vsel %vm227_vm14, 0, %v313_v4  ;;  %vm435_vm5 = vcmp.le.f32.partialorder %v434_v26, 0.7853982  ;;  %vm526_vm9 = vweird.f32 %v878_v9 }
 0x1ac   :  { %576 = vst.msk [vmem:[%s1097_s2 + $0x10] sm:$0xff] %vm573_vm12, %v552_v46  ;;  %v542_v62 = vsub.f32 %v762_v13, %v538_v48  ;;  %v314_v11 = vsel %vm227_vm14, %v770_v22, %v311_v1  ;;  %v497_v29 = vshll.u32 %v496_v35, 30  ;;  %v319_v41 = vadd.s32 3, %v315_v15 }
 0x1ad   :  { %655 = vcosq.f32 %v314_v11  ;;  %v520_v7 = vsub.s32 4, %v496_v35 }
 0x1ae   :  { %v546_v60 = vsub.f32 0.0, %v542_v62  ;;  %657 = vsinq.f32 %v314_v11  ;;  %v498_v13 = vsub.s32 %v494_v52, %v497_v29  ;;  %v320_v18 = vand.u32 3, %v319_v41 }
 0x1af   :  { %v521_v0 = vsel %vm436_vm4, %v520_v7, %v496_v35 }
 0x1b0   :  { %v550_v43 = vmul.f32 %v546_v60, %v106_v63  ;;  %v500_v16 = vsub.s32 0, %v498_v13  ;;  %vm325_vm15 = vcmp.eq.s32.totalorder %v320_v18, 2  ;;  %vm321_vm1 = vcmp.lt.s32.totalorder %v320_v18, 2 }
 0x1b1   :  { %vm322_vm2 = vcmp.eq.s32.totalorder %v320_v18, 0  ;;  %v523_v3 = vsel %vm435_vm5, 0, %v521_v0 }
 0x1b2   :  { %574 = vst.msk [vmem:[%s1097_s2] sm:$0xff] %vm573_vm12, %v550_v43  ;;  %v595_v12 = vmin.u32 %v500_v16, %v498_v13 }
 0x1b4   :  { %v502_v10 = vclz %v595_v12 }
 0x1b6   :  { %v596_v27 = vadd.s32 4294967294, %v502_v10 }
 0x1b7   :  { %v656_v45 = vpop.eup %655 }
 0x1b8   :  { %v658_v38 = vpop.eup %657  ;;  %v326_v30 = vxor.u32 2147483648, %v656_v45  ;;  %vm597_vm0 = vcmp.lt.s32.totalorder %v596_v27, 0 }
 0x1b9   :  { %v323_v32 = vxor.u32 2147483648, %v658_v38  ;;  %v505_v63 = vsel %vm597_vm0, 0, %v596_v27 }
 0x1ba   :  { %v327_v57 = vsel %vm325_vm15, %v326_v30, %v658_v38  ;;  %v506_v36 = vsub.s32 32, %v505_v63  ;;  %v510_v58 = vsub.s32 4294967266, %v505_v63  ;;  %v507_v47 = vshll.u32 %v498_v13, %v505_v63 }
 0x1bb   :  { %v324_v39 = vsel %vm322_vm2, %v656_v45, %v323_v32 }
 0x1bc   :  { %v328_v42 = vsel %vm321_vm1, %v324_v39, %v327_v57  ;;  %v508_v59 = vshrl.u32 %v490_v34, %v506_v36  ;;  %v511_v37 = vadd.s32 127, %v510_v58 }
 0x1bd   :  { %v329_v8 = vsel %vm318_vm3, nan, %v328_v42 }
 0x1be   :  { %v539_v49 = vmul.f32 0.5, %v329_v8  ;;  %v509_v21 = vor.u32 %v508_v59, %v507_v47  ;;  %v512_v51 = vshll.u32 %v511_v37, 23 }
 0x1c0   :  { %v543_v28 = vsub.f32 %v770_v22, %v539_v49  ;;  %v513_v31 = vor.u32 4788187, %v512_v51  ;;  %v516_v56 = vcvt.s32.f32 %v509_v21 }
 0x1c2   :  { %v547_v33 = vsub.f32 0.0, %v543_v28  ;;  %v514_v54 = vand.u32 2147483647, %v513_v31 }
 0x1c4   :  { %v551_v50 = vmul.f32 %v547_v33, %v107_v5  ;;  %v517_v6 = vmul.f32 %v516_v56, %v514_v54  ;;  %v527_v5 = vadd.s32 3, %v523_v3 }
 0x1c6   :  { %575 = vst.msk [vmem:[%s1097_s2 + $0x8] sm:$0xff] %vm573_vm12, %v551_v50  ;;  %v518_v23 = vxor.u32 2147483648, %v517_v6  ;;  %v528_v2 = vand.u32 3, %v527_v5 }
 0x1c8   :  { %v519_v22 = vsel %vm436_vm4, %v518_v23, %v517_v6  ;;  %vm533_vm6 = vcmp.eq.s32.totalorder %v528_v2, 2  ;;  %vm530_vm7 = vcmp.eq.s32.totalorder %v528_v2, 0  ;;  %vm529_vm8 = vcmp.lt.s32.totalorder %v528_v2, 2 }
 0x1c9   :  { %v522_v17 = vsel %vm435_vm5, %v878_v9, %v519_v22 }
 0x1ca   :  { %659 = vcosq.f32 %v522_v17 }
 0x1cb   :  { %661 = vsinq.f32 %v522_v17 }
 0x1d4   :  { %v660_v20 = vpop.eup %659 }
 0x1d5   :  { %v662_v19 = vpop.eup %661  ;;  %v534_v53 = vxor.u32 2147483648, %v660_v20 }
 0x1d6   :  { %v531_v55 = vxor.u32 2147483648, %v662_v19 }
 0x1d7   :  { %v535_v46 = vsel %vm533_vm6, %v534_v53, %v662_v19 }
 0x1d8   :  { %v532_v61 = vsel %vm530_vm7, %v660_v20, %v531_v55 }
 0x1d9   :  { %v536_v26 = vsel %vm529_vm8, %v532_v61, %v535_v46 }
 0x1da   :  { %v537_v40 = vsel %vm526_vm9, nan, %v536_v26 }
 0x1db   :  { %v541_v52 = vmul.f32 0.5, %v537_v40 }
 0x1dd   :  { %v545_v48 = vsub.f32 %v878_v9, %v541_v52 }
 0x1df   :  { %v549_v24 = vsub.f32 0.0, %v545_v48 }
 0x1e1   :  { %v553_v44 = vmul.f32 %v549_v24, %v109_v25 }
 0x1e3   :  { %577 = vst.msk [vmem:[%s1097_s2 + $0x18] sm:$0xff] %vm573_vm12, %v553_v44 }

</bundles_post_ra>
